<compile_context>
chip_gen: v6e
topology: v6e:2x2x1
jax: 0.10.0
libtpu: 0.0.40
codegen_flags: <defaults>
</compile_context>

<pallas_src>
import functools
import math

import jax
import jax.numpy as jnp
from jax.experimental import pallas as pl
from jax.experimental.pallas import tpu as pltpu

_MIB = 1024 * 1024
_TINY_TRAILING_K = 64   # below this a trailing-lane Pallas reduce buys nothing


def _cdiv(a, b):
    return -(-a // b)


def _round_up(x, m):
    return _cdiv(x, m) * m


def _sublane_mult(dtype):
    # Native sublane packing: 8 rows for 4-byte, 16 for 2-byte, 32 for 1-byte.
    return {4: 8, 2: 16, 1: 32}.get(jnp.dtype(dtype).itemsize, 8)


def _vmem_capacity_bytes():
    try:
        cap = getattr(pltpu.get_tpu_info(), "vmem_capacity_bytes", None)
        if cap:
            return int(cap)
    except Exception:
        pass
    return 64 * _MIB  # conservative default (v7x per-core VMEM)


def _tile_budget_bytes(vmem_cap):
    # Per *input tile* byte budget (the pipeline double-buffers it):
    # 128 MiB parts (v5e/v6e) -> 16 MiB tiles, 64 MiB parts (v7x) -> 8 MiB.
    return int(min(16 * _MIB, max(4 * _MIB, vmem_cap // 8)))


def _pick_tile(n, target, mult):
    """Tile for an axis of length n.

    Returns either n itself (axis fits in one block, any size) or a multiple
    of `mult` <= max(target, mult).  Prefers a divisor of n (no partial
    blocks); otherwise the last grid block is partial — Pallas drops
    out-of-bounds writes, and reduction-axis tails are masked in-kernel.
    Never pads in HBM.
    """
    target = max(int(target), mult)
    if n <= target:
        return n
    best = (target // mult) * mult
    d = best
    floor = max(mult, best // 2)
    while d >= floor:
        if n % d == 0:
            return d
        d -= mult
    return best


def _vmem_limit(vmem_cap, in_tile_bytes, out_tile_bytes, acc_bytes):
    # 2x double-buffered input, 2x output block, resident accumulator, headroom.
    need = 2 * in_tile_bytes + 2 * out_tile_bytes + acc_bytes + 8 * _MIB
    return int(min(vmem_cap * 3 // 4, max(24 * _MIB, need)))


# ---------------------------------------------------------------------------
# Trailing (lane-axis) reduction: mean over the last axis of an (M, K) view.
# ---------------------------------------------------------------------------
def _mean_lanes_simple_kernel(x_ref, o_ref, *, inv_k):
    x = x_ref[...].astype(jnp.float32)
    o_ref[...] = (jnp.sum(x, axis=1, keepdims=True) * inv_k).astype(o_ref.dtype)


def _mean_lanes_acc_kernel(x_ref, o_ref, acc_ref, *, inv_k, k_true, tk):
    kk = pl.program_id(1)

    @pl.when(kk == 0)
    def _init():
        acc_ref[...] = jnp.zeros_like(acc_ref)

    x = x_ref[...].astype(jnp.float32)                    # (tm, tk)
    if k_true % tk != 0:                                  # static: mask K tail
        lane = jax.lax.broadcasted_iota(jnp.int32, x.shape, 1)
        x = jnp.where(kk * tk + lane < k_true, x, 0.0)

    # Accumulate at (tm, 128): pure-VALU adds of the tk//128 lane groups; the
    # 128 -> 1 cross-lane (XLU) reduce runs once, in the finalize branch.
    part = x[:, 0:128]
    for g in range(1, tk // 128):
        part = part + x[:, g * 128:(g + 1) * 128]
    acc_ref[...] += part

    @pl.when(kk == pl.num_programs(1) - 1)
    def _store():
        s = jnp.sum(acc_ref[...], axis=1, keepdims=True)
        o_ref[...] = (s * inv_k).astype(o_ref.dtype)


def _mean_trailing(x2d):
    """Mean over the last axis of a (M, K) array."""
    m, k = x2d.shape
    dtype = x2d.dtype
    itemsize = jnp.dtype(dtype).itemsize
    sub = _sublane_mult(dtype)
    vmem_cap = _vmem_capacity_bytes()
    budget = _tile_budget_bytes(vmem_cap)
    inv_k = 1.0 / float(k)
    total_bytes = m * k * itemsize

    if sub * k * itemsize <= budget:
        tk, num_k = k, 1
        tm = _pick_tile(m, max(sub, budget // (k * itemsize)), sub)
    else:
        # K-tiled: cap tk so the in-kernel lane-group accumulate stays a
        # modest unroll (<= 64 adds); rows take the remaining byte budget.
        tk = _pick_tile(k, min(64 * 128, budget // (sub * itemsize)), 128)
        tm = _pick_tile(m, max(sub, budget // (tk * itemsize)), sub)
        num_k = _cdiv(k, tk)

    # v7x has two TensorCores that only share work via parallel grid axes:
    # large problems must expose >= 2 (>= 8 for very large) row blocks.
    # TODO(synk): for genuinely skinny M with huge K, split K across a
    # parallel axis with per-block partial sums + a tiny combine kernel.
    if total_bytes > 64 * _MIB and _cdiv(m, tm) < 8 and m >= 8 * sub:
        tm = min(tm, max(sub, _round_up(_cdiv(m, 8), sub)))
    elif total_bytes > 4 * _MIB and _cdiv(m, tm) < 2 and m >= 2 * sub:
        tm = min(tm, max(sub, _round_up(_cdiv(m, 2), sub)))
    num_m = _cdiv(m, tm)

    in_tile = tm * tk * itemsize
    out_tile = tm * itemsize
    acc_bytes = tm * 128 * 4 if num_k > 1 else 0
    limit = _vmem_limit(vmem_cap, in_tile, out_tile, acc_bytes)

    if num_k == 1:
        out = pl.pallas_call(
            functools.partial(_mean_lanes_simple_kernel, inv_k=inv_k),
            out_shape=jax.ShapeDtypeStruct((m, 1), dtype),
            grid_spec=pltpu.PrefetchScalarGridSpec(
                num_scalar_prefetch=0,
                grid=(num_m,),
                in_specs=[pl.BlockSpec((tm, k), lambda i: (i, 0))],
                out_specs=pl.BlockSpec((tm, 1), lambda i: (i, 0)),
            ),
            compiler_params=pltpu.CompilerParams(
                dimension_semantics=("parallel",),
                vmem_limit_bytes=limit),
        )(x2d)
    else:
        kernel = functools.partial(_mean_lanes_acc_kernel,
                                   inv_k=inv_k, k_true=k, tk=tk)
        # NOTE: for very long K loops, pipeline_mode=pl.Buffered(3) on the
        # input spec is worth a sweep (3x the tile must still fit the limit).
        out = pl.pallas_call(
            kernel,
            out_shape=jax.ShapeDtypeStruct((m, 1), dtype),
            grid_spec=pltpu.PrefetchScalarGridSpec(
                num_scalar_prefetch=0,
                grid=(num_m, num_k),
                in_specs=[pl.BlockSpec((tm, tk), lambda i, kk: (i, kk))],
                out_specs=pl.BlockSpec((tm, 1), lambda i, kk: (i, 0)),
                scratch_shapes=[pltpu.VMEM((tm, 128), jnp.float32)],
            ),
            compiler_params=pltpu.CompilerParams(
                dimension_semantics=("parallel", "arbitrary"),
                vmem_limit_bytes=limit),
        )(x2d)
    return out[:, 0]


# ---------------------------------------------------------------------------
# Middle (sublane-axis) reduction: mean over axis 1 of a (P, K, Q) view.
# Per-(p, q) sums land on lanes -> lane-dense output, no HBM transpose.
# ---------------------------------------------------------------------------
def _mean_sub_simple_kernel(x_ref, o_ref, *, inv_k):
    x = x_ref[0].astype(jnp.float32)                      # (k, tq)
    o_ref[0] = (jnp.sum(x, axis=0, keepdims=True) * inv_k).astype(o_ref.dtype)


def _mean_sub_acc_kernel(x_ref, o_ref, acc_ref, *, inv_k, k_true, tk):
    kk = pl.program_id(2)

    @pl.when(kk == 0)
    def _init():
        acc_ref[...] = jnp.zeros_like(acc_ref)

    x = x_ref[0].astype(jnp.float32)                      # (tk, tq)
    if k_true % tk != 0:                                  # static: mask K tail
        row = jax.lax.broadcasted_iota(jnp.int32, x.shape, 0)
        x = jnp.where(kk * tk + row < k_true, x, 0.0)

    # Accumulate at (8, tq): (tk, tq) -> (tk//8, 8, tq) splits the sublane
    # axis at the native vreg-row boundary (free reshape); the axis-0 sum is
    # VALU adds.  The 8 -> 1 sublane (XLU) reduce runs once, in the finalize.
    tq = x.shape[1]
    acc_ref[...] += jnp.sum(x.reshape(tk // 8, 8, tq), axis=0)

    @pl.when(kk == pl.num_programs(2) - 1)
    def _store():
        s = jnp.sum(acc_ref[...], axis=0, keepdims=True)
        o_ref[0] = (s * inv_k).astype(o_ref.dtype)


def _mean_middle(x3d):
    """Mean over axis 1 of a (P, K, Q) array."""
    p, k, q = x3d.shape
    dtype = x3d.dtype
    itemsize = jnp.dtype(dtype).itemsize
    sub = _sublane_mult(dtype)
    vmem_cap = _vmem_capacity_bytes()
    budget = _tile_budget_bytes(vmem_cap)
    inv_k = 1.0 / float(k)
    total_bytes = p * k * q * itemsize

    # Lane axis: when K is large, cap tq near 4K lanes and give the rest of
    # the byte budget to the (sublane) reduction axis — fewer K grid steps,
    # small accumulator, taller strided input DMAs.  When K is small, let tq
    # grow so each tile still fills the budget.
    tq_target = max(32 * 128, budget // (max(k, sub) * itemsize))
    tq = _pick_tile(q, tq_target, 128)

    # Expose parallel blocks for v7x's two TensorCores on large problems.
    def _ensure_blocks(tq_cur, want):
        if p * _cdiv(q, tq_cur) >= want:
            return tq_cur
        need_q = _cdiv(want, max(p, 1))
        if q < need_q * 128:
            return tq_cur
        return min(tq_cur, max(128, _round_up(_cdiv(q, need_q), 128)))

    if total_bytes > 64 * _MIB:
        tq = _ensure_blocks(tq, 8)
    elif total_bytes > 4 * _MIB:
        tq = _ensure_blocks(tq, 2)
    num_q = _cdiv(q, tq)

    if k * tq * itemsize <= budget:
        tk, num_k = k, 1
    else:
        tk = _pick_tile(k, max(sub, budget // (tq * itemsize)), sub)
        num_k = _cdiv(k, tk)

    in_tile = tk * tq * itemsize
    out_tile = tq * itemsize
    acc_bytes = 8 * tq * 4 if num_k > 1 else 0
    limit = _vmem_limit(vmem_cap, in_tile, out_tile, acc_bytes)

    if num_k == 1:
        out = pl.pallas_call(
            functools.partial(_mean_sub_simple_kernel, inv_k=inv_k),
            out_shape=jax.ShapeDtypeStruct((p, 1, q), dtype),
            grid_spec=pltpu.PrefetchScalarGridSpec(
                num_scalar_prefetch=0,
                grid=(p, num_q),
                in_specs=[pl.BlockSpec((1, k, tq), lambda i, j: (i, 0, j))],
                out_specs=pl.BlockSpec((1, 1, tq), lambda i, j: (i, 0, j)),
            ),
            compiler_params=pltpu.CompilerParams(
                dimension_semantics=("parallel", "parallel"),
                vmem_limit_bytes=limit),
        )(x3d)
    else:
        kernel = functools.partial(_mean_sub_acc_kernel,
                                   inv_k=inv_k, k_true=k, tk=tk)
        out = pl.pallas_call(
            kernel,
            out_shape=jax.ShapeDtypeStruct((p, 1, q), dtype),
            grid_spec=pltpu.PrefetchScalarGridSpec(
                num_scalar_prefetch=0,
                grid=(p, num_q, num_k),
                in_specs=[pl.BlockSpec((1, tk, tq),
                                       lambda i, j, kk: (i, kk, j))],
                out_specs=pl.BlockSpec((1, 1, tq), lambda i, j, kk: (i, 0, j)),
                scratch_shapes=[pltpu.VMEM((8, tq), jnp.float32)],
            ),
            compiler_params=pltpu.CompilerParams(
                dimension_semantics=("parallel", "parallel", "arbitrary"),
                vmem_limit_bytes=limit),
        )(x3d)
    return out[:, 0, :]


# ---------------------------------------------------------------------------
# Wrapper: torch AveragePool(dim).forward(x) == x.mean(dim)
# ---------------------------------------------------------------------------
def _mean_contiguous_run(x, d0, d1):
    """Mean over the contiguous axis run [d0, d1] of x (free reshapes only)."""
    shape = x.shape
    kept_shape = shape[:d0] + shape[d1 + 1:]
    k_total = math.prod(shape[d0:d1 + 1])
    axes = tuple(range(d0, d1 + 1))

    if k_total == 1:
        return x.reshape(kept_shape)

    m = math.prod(shape[:d0])
    q = math.prod(shape[d1 + 1:])

    if q == 1:
        # Trailing (or effectively trailing) reduction: (M, K), reduce lanes.
        if k_total < _TINY_TRAILING_K:
            # Tiny trailing K: only K of 128 lanes per vreg would be used;
            # plain XLA mean is already at the HBM roofline here.
            return jnp.mean(x.astype(jnp.float32), axis=axes).astype(x.dtype)
        return _mean_trailing(x.reshape(m, k_total)).reshape(kept_shape)

    # Middle reduction: (P, K, Q), reduce sublanes; output stays lane-dense.
    return _mean_middle(x.reshape(m, k_total, q)).reshape(kept_shape)


def average_pool(x, dim):
    """Pallas TPU implementation of torch `AveragePool(dim)`: x.mean(dim)."""
    x = jnp.asarray(x)
    if not jnp.issubdtype(x.dtype, jnp.floating):
        # torch.mean raises for integer/bool tensors as well.
        raise TypeError(
            f"average_pool: input must be floating point, got {x.dtype}")

    ndim = x.ndim
    dims = tuple(dim) if isinstance(dim, (tuple, list)) else (int(dim),)
    dims = tuple(sorted(set(d % ndim for d in dims)))
    if not dims:
        return x
    if x.size == 0 or any(x.shape[d] == 0 for d in dims):
        return jnp.mean(x.astype(jnp.float32), axis=dims).astype(x.dtype)

    # Split the reduced dims into contiguous runs and reduce run-by-run,
    # starting with the last run so earlier axis indices stay valid.  Each
    # pass is a free reshape + a trailing- or middle-axis kernel; later
    # passes touch <= 1/K of the data, and no HBM transpose is ever needed.
    runs = [[dims[0]]]
    for d in dims[1:]:
        if d == runs[-1][-1] + 1:
            runs[-1].append(d)
        else:
            runs.append([d])

    out = x
    for run in reversed(runs):
        out = _mean_contiguous_run(out, run[0], run[-1])
    return out


if __name__ == "__main__":
    key = jax.random.PRNGKey(0)
    x = jax.random.normal(key, (2, 4, 16, 16), dtype=jnp.float32)

    # Global average pool over spatial dims (the wrapper's use case) plus
    # other `dim` configurations covering every kernel path.
    for dim in [(2, 3), -1, 1, (1, 3), (0, 1, 2, 3)]:
        out = jax.block_until_ready(average_pool(x, dim))
        ref = jnp.mean(x, axis=dim)
        assert out.shape == ref.shape, (dim, out.shape, ref.shape)
        assert out.dtype == ref.dtype, (dim, out.dtype, ref.dtype)
        assert jnp.allclose(out, ref, atol=1e-5, rtol=1e-5), dim

    # bf16 input (exercises the dtype-aware sublane alignment).
    xb = x.astype(jnp.bfloat16)
    ob = jax.block_until_ready(average_pool(xb, (2, 3)))
    rb = jnp.mean(xb.astype(jnp.float32), axis=(2, 3))
    assert ob.shape == rb.shape and ob.dtype == jnp.bfloat16
    assert jnp.allclose(ob.astype(jnp.float32), rb, atol=2e-2, rtol=2e-2)

    print("KERNEL_OK")
</pallas_src>

<mosaic_0001>
module attributes {stable_mosaic.version = 11 : i64} {
  func.func @_mean_lanes_simple_kernel(%arg0: i32, %arg1: memref<8x256xf32, #tpu.memory_space<vmem>>, %arg2: memref<8x1xf32, #tpu.memory_space<vmem>>) attributes {dimension_semantics = [#tpu.dimension_semantics<parallel>], iteration_bounds = array<i64: 1>, scalar_prefetch = 0 : i64, scratch_operands = 0 : i64, tpu.core_type = #tpu.core_type<tc>, window_params = [{transform_indices = @transform_0, window_bounds = array<i64: 8, 256>}, {transform_indices = @transform_1, window_bounds = array<i64: 8, 1>}]} {
    %c0 = arith.constant 0 : index
    %c0_0 = arith.constant 0 : index
    %0 = vector.load %arg1[%c0, %c0_0] : memref<8x256xf32, #tpu.memory_space<vmem>>, vector<8x256xf32>
    %cst = arith.constant dense<0.000000e+00> : vector<8xf32>
    %1 = vector.multi_reduction <add>, %0, %cst [1] : vector<8x256xf32> to vector<8xf32>
    %2 = vector.shape_cast %1 : vector<8xf32> to vector<8x1xf32>
    %cst_1 = arith.constant 3.906250e-03 : f32
    %3 = vector.broadcast %cst_1 : f32 to vector<8x1xf32>
    %4 = arith.mulf %2, %3 : vector<8x1xf32>
    %c0_2 = arith.constant 0 : index
    %c0_3 = arith.constant 0 : index
    %5 = vector.load %arg2[%c0_2, %c0_3] : memref<8x1xf32, #tpu.memory_space<vmem>>, vector<8x1xf32>
    tpu.vector_store %arg2[%c0_2, %c0_3], %4 {strides = array<i32>} : memref<8x1xf32, #tpu.memory_space<vmem>>, vector<8x1xf32>,
    return
  }
  func.func @transform_0(%arg0: i32) -> (i32, i32) {
    %c0_i32 = arith.constant 0 : i32
    %c0_i32_0 = arith.constant 0 : i32
    return %arg0, %c0_i32 : i32, i32
  }
  func.func @transform_1(%arg0: i32) -> (i32, i32) {
    %c0_i32 = arith.constant 0 : i32
    %c0_i32_0 = arith.constant 0 : i32
    return %arg0, %c0_i32 : i32, i32
  }
}

</mosaic_0001>

<bundles_post_ra>
// kernel: tpu_custom_call.1
= control target key start
LH: loop header
LB: loop body
LE: loop exit
PB: predicated region body
PF: predicated region fallthrough
CT: control target
= control target key end

     0   :  { %6 = vsyncpa [#allocation3], 0  ;;  %s56_s6 = smov [#allocation2]   ;;  %s73_s0 = inlined_call_operand.hbm [shape: f32[8,256], index: 0, kind: input, shape index: {}]   ;;  %s74_s1 = inlined_call_operand.vmem [shape: f32[8,1], index: 1, kind: output, shape index: {}]  }
   0x1   :  { %s13_s7 = sshll.u32 %s56_s6, 4  ;;  %s14_s7 = int_to_ptr.vmem [resolvable:$true] %s13_s7 }
   0x2   :  { %s42_s8 = scalar_lea.vmem %s14_s7, 256  ;;  %p47_p1 = scmp.lt.s32.totalorder %s14_s7, %s14_s7 }
   0x3   :  { %p43_p0 = scmp.ne.s32.totalorder %s14_s7, %s42_s8  ;;  %p48_p2 = scmp.lt.s32.totalorder %s42_s8, %s42_s8 }
   0x5   :  { %p49_p3 = por %p48_p2, %p47_p1 }
   0x7   :  { %p50_p4 = pnand %p49_p3, %p43_p0 }
   0x9   :  { %53 = shalt.err (!%p50_p4)
}
   0xa   :  { %16 = dma.hbm_to_vmem [thread:$0]  %s73_s0, 256, %s14_s7, [#allocation3]  }
   0xb   :  { %54 = dma.done.wait [#allocation3], 256  }
   0xc   :  { %55 = vsyncadd [#allocation3], 4294967040  ;;  %v20_v0 = vld [vmem:[#allocation2] sm:$0xff]  ;;  %v21_v1 = vld [vmem:[#allocation2 + $0x8] sm:$0xff]  ;;  %vm26_vm0 = vcmask 7168  }
   0xd   :  { %v22_v2 = vadd.f32 %v21_v1, %v20_v0 }
   0xf   :  { %23 = vadd.xlane.f32.xlu0 %v22_v2 }
  0x98   :  { %v24_v3 = vpop.xlane.xlu0 %23 }
  0x99   :  { %v25_v4 = vmul.f32 0.00390625, %v24_v3 }
  0x9b   :  { %27 = vst.msk [vmem:[%s74_s1] sm:$0xff] %vm26_vm0, %v25_v4 }
  0x9c   :  { %32 = vsyncpa [#allocation3], 1 }

</bundles_post_ra>
